<compile_context>
chip_gen: v5e
topology: v5e:2x2
jax: 0.10.0
libtpu: 0.0.40
codegen_flags: <defaults>
</compile_context>

<pallas_src>
import functools
import math

import jax
import jax.numpy as jnp
from jax.experimental import pallas as pl
from jax.experimental.pallas import tpu as pltpu

# ----------------------------- configuration --------------------------------
N_HEADS = 4
D_EMBED = 32           # d_embed
D_CROSS = 24           # d_cross
D_HEAD = D_EMBED // N_HEADS
BATCH = 2
SEQ_Q = 8              # query sequence length (x)
SEQ_K = 8              # context sequence length (y)


# ------------------------------- kernel -------------------------------------
def cross_attention_kernel(x_ref, y_ref,
                           wq_ref, bq_ref,
                           wkv_ref, bkv_ref,
                           wo_ref, bo_ref,
                           mask_ref,
                           o_ref,
                           q_scr, kv_scr,
                           *, n_heads):
    x2 = x_ref[...]                                    # (B*Lq, D_EMBED)
    y2 = y_ref[...]                                    # (B*Lk, D_CROSS)
    nq = x2.shape[0]                                   # B*Lq
    nk = y2.shape[0]                                   # B*Lk
    d_head = wq_ref.shape[2]

    # Per-head projections, written straight into (head, batch, seq)-ordered
    # VMEM scratch via sublane-aligned static slices (no lane slicing of
    # activations, no materializing concatenate).  Q already carries the
    # 1/sqrt(d_head) scale (folded into wq/bq on the host); K and V share one
    # fused (D_CROSS, 2*d_head) matmul per head.
    for h in range(n_heads):
        q_scr[h * nq:(h + 1) * nq, :] = (
            jnp.dot(x2, wq_ref[h], preferred_element_type=jnp.float32) + bq_ref[h])
        kv_scr[h * nk:(h + 1) * nk, :] = (
            jnp.dot(y2, wkv_ref[h], preferred_element_type=jnp.float32) + bkv_ref[h])

    qr = q_scr[...]                                    # (H*B*Lq, d_head), pre-scaled
    kvr = kv_scr[...]                                  # (H*B*Lk, 2*d_head)
    kr = kvr[:, :d_head]
    vr = kvr[:, d_head:]

    # One score matmul for all heads and batches (rows/cols ordered (h, b, seq)),
    # contracted on d_head via dot_general (no explicit .T).  Masking is a single
    # VPU add of the precomputed block-diagonal additive bias (0 / -1e30),
    # applied BEFORE the row max so softmax statistics stay correct.
    # NOTE: mask layout is tied to the (head, batch, seq) scratch write order.
    s = jax.lax.dot_general(qr, kr, (((1,), (1,)), ((), ())),
                            preferred_element_type=jnp.float32)   # (H*B*Lq, H*B*Lk)
    s = s + mask_ref[...]

    m = jnp.max(s, axis=-1, keepdims=True)
    p = jnp.exp(s - m)                                 # masked entries underflow to 0
    l = jnp.sum(p, axis=-1, keepdims=True)             # >= 1: every row has its own block
    inv = pl.reciprocal(l, approx=True)                # EUP slot, nearly free
    inv = inv * (2.0 - l * inv)                        # one Newton step -> ~f32 exact

    # Normalize AFTER P@V: inv broadcasts over only d_head lanes and the MXU
    # push of P@V does not wait on the reciprocal.
    o = jnp.dot(p, vr, preferred_element_type=jnp.float32) * inv  # (H*B*Lq, d_head)

    # Output projection: sum_h o_h @ Wo_h == concat_h(o_h) @ Wo^T, computed
    # without a lane concatenate (slices are sublane-aligned row blocks).
    out = jnp.dot(o[0:nq, :], wo_ref[0], preferred_element_type=jnp.float32)
    for h in range(1, n_heads):
        out = out + jnp.dot(o[h * nq:(h + 1) * nq, :], wo_ref[h],
                            preferred_element_type=jnp.float32)
    out = out + bo_ref[...]
    o_ref[...] = out.astype(o_ref.dtype)


# ------------------------------ wrapper --------------------------------------
@jax.jit
def cross_attention(x, y, params):
    """x: (B, Lq, D_EMBED), y: (B, Lk, D_CROSS) -> (B, Lq, D_EMBED)."""
    B, Lq, _ = x.shape
    _, Lk, _ = y.shape
    wq, bq, wk, bk, wv, bv, wo, bo = params

    # Host-side (traced-once, effectively free) weight re-layout.  nn.Linear
    # stores W as (out, in); transpose to (in, out) and split the head axis out
    # of the output features so the kernel builds the (head, batch, seq) row
    # layout with plain matmuls.
    def split_in_proj(w, b):
        wt = w.T                                                   # (in, H*D_HEAD)
        w_h = wt.reshape(wt.shape[0], N_HEADS, D_HEAD).transpose(1, 0, 2)  # (H, in, D_HEAD)
        b_h = b.reshape(N_HEADS, 1, D_HEAD)                        # (H, 1, D_HEAD)
        return w_h, b_h

    scale = 1.0 / math.sqrt(D_HEAD)
    wq_h, bq_h = split_in_proj(wq, bq)
    wq_h = wq_h * scale                 # fold 1/sqrt(d_head) into the Q projection
    bq_h = bq_h * scale
    wk_h, bk_h = split_in_proj(wk, bk)
    wv_h, bv_h = split_in_proj(wv, bv)
    wkv_h = jnp.concatenate([wk_h, wv_h], axis=-1)    # (H, D_CROSS, 2*D_HEAD)
    bkv_h = jnp.concatenate([bk_h, bv_h], axis=-1)    # (H, 1, 2*D_HEAD)
    wo_h = wo.T.reshape(N_HEADS, D_HEAD, D_EMBED)     # rows of Wo^T are (head, d_head)
    bo2 = bo.reshape(1, D_EMBED)

    # Precomputed block-diagonal additive mask: row // Lq and col // Lk both
    # equal h*B + b for the (head, batch, seq) row layout, so equality keeps
    # exactly the same-head, same-batch blocks.
    rows = jnp.arange(N_HEADS * B * Lq, dtype=jnp.int32)[:, None] // Lq
    cols = jnp.arange(N_HEADS * B * Lk, dtype=jnp.int32)[None, :] // Lk
    mask = jnp.where(rows == cols, 0.0, -1e30).astype(jnp.float32)

    # Fold batch into rows (leading-dim reshape, free) -> single kernel invocation.
    x2 = x.reshape(B * Lq, D_EMBED)
    y2 = y.reshape(B * Lk, D_CROSS)

    kernel = functools.partial(cross_attention_kernel, n_heads=N_HEADS)

    out2 = pl.pallas_call(
        kernel,
        out_shape=jax.ShapeDtypeStruct((B * Lq, D_EMBED), x.dtype),
        scratch_shapes=[
            pltpu.VMEM((N_HEADS * B * Lq, D_HEAD), jnp.float32),       # Q rows
            pltpu.VMEM((N_HEADS * B * Lk, 2 * D_HEAD), jnp.float32),   # fused K|V rows
        ],
        # No grid: everything (a few KiB) lives in VMEM for one invocation.
    )(x2, y2, wq_h, bq_h, wkv_h, bkv_h, wo_h, bo2, mask)

    return out2.reshape(B, Lq, D_EMBED)


# ----------------------- pure-JAX reference (for checking) -------------------
def cross_attention_ref(x, y, params):
    wq, bq, wk, bk, wv, bv, wo, bo = params
    B, Lq, D = x.shape
    q = x @ wq.T + bq
    k = y @ wk.T + bk
    v = y @ wv.T + bv
    q = q.reshape(B, Lq, N_HEADS, D_HEAD).transpose(0, 2, 1, 3)
    k = k.reshape(B, -1, N_HEADS, D_HEAD).transpose(0, 2, 1, 3)
    v = v.reshape(B, -1, N_HEADS, D_HEAD).transpose(0, 2, 1, 3)
    w = jnp.einsum("bhqd,bhkd->bhqk", q, k) / math.sqrt(D_HEAD)
    a = jax.nn.softmax(w, axis=-1)
    o = jnp.einsum("bhqk,bhkd->bhqd", a, v)
    o = o.transpose(0, 2, 1, 3).reshape(B, Lq, D)
    return o @ wo.T + bo


# --------------------------------- main ---------------------------------------
if __name__ == "__main__":
    key = jax.random.PRNGKey(0)
    keys = jax.random.split(key, 10)

    x = jax.random.normal(keys[0], (BATCH, SEQ_Q, D_EMBED), dtype=jnp.float32)
    y = jax.random.normal(keys[1], (BATCH, SEQ_K, D_CROSS), dtype=jnp.float32)

    # Deterministic parameter init (nn.Linear weight shape = (out, in)).
    def init_w(k, out_dim, in_dim):
        bound = 1.0 / math.sqrt(in_dim)
        return jax.random.uniform(k, (out_dim, in_dim), jnp.float32, -bound, bound)

    def init_b(k, out_dim, in_dim):
        bound = 1.0 / math.sqrt(in_dim)
        return jax.random.uniform(k, (out_dim,), jnp.float32, -bound, bound)

    params = (
        init_w(keys[2], D_EMBED, D_EMBED), init_b(keys[3], D_EMBED, D_EMBED),  # q_proj
        init_w(keys[4], D_EMBED, D_CROSS), init_b(keys[5], D_EMBED, D_CROSS),  # k_proj
        init_w(keys[6], D_EMBED, D_CROSS), init_b(keys[7], D_EMBED, D_CROSS),  # v_proj
        init_w(keys[8], D_EMBED, D_EMBED), init_b(keys[9], D_EMBED, D_EMBED),  # out_proj
    )

    out = cross_attention(x, y, params)
    out = jax.block_until_ready(out)

    ref = cross_attention_ref(x, y, params)
    assert out.shape == (BATCH, SEQ_Q, D_EMBED)
    assert jnp.allclose(out, ref, atol=1e-4, rtol=1e-4), "mismatch vs reference"

    print("KERNEL_OK")
</pallas_src>

<mosaic_0001>
module attributes {stable_mosaic.version = 11 : i64} {
  func.func @cross_attention_kernel(%arg0: memref<16x32xf32, #tpu.memory_space<vmem>>, %arg1: memref<16x24xf32, #tpu.memory_space<vmem>>, %arg2: memref<4x32x8xf32, #tpu.memory_space<vmem>>, %arg3: memref<4x1x8xf32, #tpu.memory_space<vmem>>, %arg4: memref<4x24x16xf32, #tpu.memory_space<vmem>>, %arg5: memref<4x1x16xf32, #tpu.memory_space<vmem>>, %arg6: memref<4x8x32xf32, #tpu.memory_space<vmem>>, %arg7: memref<1x32xf32, #tpu.memory_space<vmem>>, %arg8: memref<64x64xf32, #tpu.memory_space<vmem>>, %arg9: memref<16x32xf32, #tpu.memory_space<vmem>>, %arg10: memref<64x8xf32, #tpu.memory_space<vmem>>, %arg11: memref<64x16xf32, #tpu.memory_space<vmem>>) attributes {dimension_semantics = [], scalar_prefetch = 0 : i64, scratch_operands = 2 : i64, tpu.core_type = #tpu.core_type<tc>} {
    %c0 = arith.constant 0 : index
    %c0_0 = arith.constant 0 : index
    %0 = vector.load %arg0[%c0, %c0_0] : memref<16x32xf32, #tpu.memory_space<vmem>>, vector<16x32xf32>
    %c0_1 = arith.constant 0 : index
    %c0_2 = arith.constant 0 : index
    %1 = vector.load %arg1[%c0_1, %c0_2] : memref<16x24xf32, #tpu.memory_space<vmem>>, vector<16x24xf32>
    %c0_3 = arith.constant 0 : index
    %c0_4 = arith.constant 0 : index
    %c0_5 = arith.constant 0 : index
    %2 = vector.load %arg2[%c0_3, %c0_4, %c0_5] : memref<4x32x8xf32, #tpu.memory_space<vmem>>, vector<1x32x8xf32>
    %3 = vector.shape_cast %2 : vector<1x32x8xf32> to vector<32x8xf32>
    %cst = arith.constant dense<0.000000e+00> : vector<16x8xf32>
    %4 = tpu.matmul %0, %3, %cst {dimension_numbers = #tpu.dot_dimension_numbers<[1], [0], [0], [1], [0, 0, 1, 1], [], []>} : vector<16x32xf32>, vector<32x8xf32>, vector<16x8xf32> -> vector<16x8xf32>
    %c0_6 = arith.constant 0 : index
    %c0_7 = arith.constant 0 : index
    %c0_8 = arith.constant 0 : index
    %5 = vector.load %arg3[%c0_6, %c0_7, %c0_8] : memref<4x1x8xf32, #tpu.memory_space<vmem>>, vector<1x1x8xf32>
    %6 = vector.shape_cast %5 : vector<1x1x8xf32> to vector<1x8xf32>
    %7 = vector.broadcast %6 : vector<1x8xf32> to vector<16x8xf32>
    %8 = arith.addf %4, %7 : vector<16x8xf32>
    %c0_9 = arith.constant 0 : index
    %c0_10 = arith.constant 0 : index
    %9 = vector.load %arg10[%c0_9, %c0_10] : memref<64x8xf32, #tpu.memory_space<vmem>>, vector<16x8xf32>
    tpu.vector_store %arg10[%c0_9, %c0_10], %8 {strides = array<i32>} : memref<64x8xf32, #tpu.memory_space<vmem>>, vector<16x8xf32>,
    %c0_11 = arith.constant 0 : index
    %c0_12 = arith.constant 0 : index
    %c0_13 = arith.constant 0 : index
    %10 = vector.load %arg4[%c0_11, %c0_12, %c0_13] : memref<4x24x16xf32, #tpu.memory_space<vmem>>, vector<1x24x16xf32>
    %11 = vector.shape_cast %10 : vector<1x24x16xf32> to vector<24x16xf32>
    %cst_14 = arith.constant dense<0.000000e+00> : vector<16x16xf32>
    %12 = tpu.matmul %1, %11, %cst_14 {dimension_numbers = #tpu.dot_dimension_numbers<[1], [0], [0], [1], [0, 0, 1, 1], [], []>} : vector<16x24xf32>, vector<24x16xf32>, vector<16x16xf32> -> vector<16x16xf32>
    %c0_15 = arith.constant 0 : index
    %c0_16 = arith.constant 0 : index
    %c0_17 = arith.constant 0 : index
    %13 = vector.load %arg5[%c0_15, %c0_16, %c0_17] : memref<4x1x16xf32, #tpu.memory_space<vmem>>, vector<1x1x16xf32>
    %14 = vector.shape_cast %13 : vector<1x1x16xf32> to vector<1x16xf32>
    %15 = vector.broadcast %14 : vector<1x16xf32> to vector<16x16xf32>
    %16 = arith.addf %12, %15 : vector<16x16xf32>
    %c0_18 = arith.constant 0 : index
    %c0_19 = arith.constant 0 : index
    %17 = vector.load %arg11[%c0_18, %c0_19] : memref<64x16xf32, #tpu.memory_space<vmem>>, vector<16x16xf32>
    tpu.vector_store %arg11[%c0_18, %c0_19], %16 {strides = array<i32>} : memref<64x16xf32, #tpu.memory_space<vmem>>, vector<16x16xf32>,
    %c1 = arith.constant 1 : index
    %c0_20 = arith.constant 0 : index
    %c0_21 = arith.constant 0 : index
    %18 = vector.load %arg2[%c1, %c0_20, %c0_21] : memref<4x32x8xf32, #tpu.memory_space<vmem>>, vector<1x32x8xf32>
    %19 = vector.shape_cast %18 : vector<1x32x8xf32> to vector<32x8xf32>
    %cst_22 = arith.constant dense<0.000000e+00> : vector<16x8xf32>
    %20 = tpu.matmul %0, %19, %cst_22 {dimension_numbers = #tpu.dot_dimension_numbers<[1], [0], [0], [1], [0, 0, 1, 1], [], []>} : vector<16x32xf32>, vector<32x8xf32>, vector<16x8xf32> -> vector<16x8xf32>
    %c1_23 = arith.constant 1 : index
    %c0_24 = arith.constant 0 : index
    %c0_25 = arith.constant 0 : index
    %21 = vector.load %arg3[%c1_23, %c0_24, %c0_25] : memref<4x1x8xf32, #tpu.memory_space<vmem>>, vector<1x1x8xf32>
    %22 = vector.shape_cast %21 : vector<1x1x8xf32> to vector<1x8xf32>
    %23 = vector.broadcast %22 : vector<1x8xf32> to vector<16x8xf32>
    %24 = arith.addf %20, %23 : vector<16x8xf32>
    %c16 = arith.constant 16 : index
    %c0_26 = arith.constant 0 : index
    %25 = vector.load %arg10[%c16, %c0_26] : memref<64x8xf32, #tpu.memory_space<vmem>>, vector<16x8xf32>
    tpu.vector_store %arg10[%c16, %c0_26], %24 {strides = array<i32>} : memref<64x8xf32, #tpu.memory_space<vmem>>, vector<16x8xf32>,
    %c1_27 = arith.constant 1 : index
    %c0_28 = arith.constant 0 : index
    %c0_29 = arith.constant 0 : index
    %26 = vector.load %arg4[%c1_27, %c0_28, %c0_29] : memref<4x24x16xf32, #tpu.memory_space<vmem>>, vector<1x24x16xf32>
    %27 = vector.shape_cast %26 : vector<1x24x16xf32> to vector<24x16xf32>
    %cst_30 = arith.constant dense<0.000000e+00> : vector<16x16xf32>
    %28 = tpu.matmul %1, %27, %cst_30 {dimension_numbers = #tpu.dot_dimension_numbers<[1], [0], [0], [1], [0, 0, 1, 1], [], []>} : vector<16x24xf32>, vector<24x16xf32>, vector<16x16xf32> -> vector<16x16xf32>
    %c1_31 = arith.constant 1 : index
    %c0_32 = arith.constant 0 : index
    %c0_33 = arith.constant 0 : index
    %29 = vector.load %arg5[%c1_31, %c0_32, %c0_33] : memref<4x1x16xf32, #tpu.memory_space<vmem>>, vector<1x1x16xf32>
    %30 = vector.shape_cast %29 : vector<1x1x16xf32> to vector<1x16xf32>
    %31 = vector.broadcast %30 : vector<1x16xf32> to vector<16x16xf32>
    %32 = arith.addf %28, %31 : vector<16x16xf32>
    %c16_34 = arith.constant 16 : index
    %c0_35 = arith.constant 0 : index
    %33 = vector.load %arg11[%c16_34, %c0_35] : memref<64x16xf32, #tpu.memory_space<vmem>>, vector<16x16xf32>
    tpu.vector_store %arg11[%c16_34, %c0_35], %32 {strides = array<i32>} : memref<64x16xf32, #tpu.memory_space<vmem>>, vector<16x16xf32>,
    %c2 = arith.constant 2 : index
    %c0_36 = arith.constant 0 : index
    %c0_37 = arith.constant 0 : index
    %34 = vector.load %arg2[%c2, %c0_36, %c0_37] : memref<4x32x8xf32, #tpu.memory_space<vmem>>, vector<1x32x8xf32>
    %35 = vector.shape_cast %34 : vector<1x32x8xf32> to vector<32x8xf32>
    %cst_38 = arith.constant dense<0.000000e+00> : vector<16x8xf32>
    %36 = tpu.matmul %0, %35, %cst_38 {dimension_numbers = #tpu.dot_dimension_numbers<[1], [0], [0], [1], [0, 0, 1, 1], [], []>} : vector<16x32xf32>, vector<32x8xf32>, vector<16x8xf32> -> vector<16x8xf32>
    %c2_39 = arith.constant 2 : index
    %c0_40 = arith.constant 0 : index
    %c0_41 = arith.constant 0 : index
    %37 = vector.load %arg3[%c2_39, %c0_40, %c0_41] : memref<4x1x8xf32, #tpu.memory_space<vmem>>, vector<1x1x8xf32>
    %38 = vector.shape_cast %37 : vector<1x1x8xf32> to vector<1x8xf32>
    %39 = vector.broadcast %38 : vector<1x8xf32> to vector<16x8xf32>
    %40 = arith.addf %36, %39 : vector<16x8xf32>
    %c32 = arith.constant 32 : index
    %c0_42 = arith.constant 0 : index
    %41 = vector.load %arg10[%c32, %c0_42] : memref<64x8xf32, #tpu.memory_space<vmem>>, vector<16x8xf32>
    tpu.vector_store %arg10[%c32, %c0_42], %40 {strides = array<i32>} : memref<64x8xf32, #tpu.memory_space<vmem>>, vector<16x8xf32>,
    %c2_43 = arith.constant 2 : index
    %c0_44 = arith.constant 0 : index
    %c0_45 = arith.constant 0 : index
    %42 = vector.load %arg4[%c2_43, %c0_44, %c0_45] : memref<4x24x16xf32, #tpu.memory_space<vmem>>, vector<1x24x16xf32>
    %43 = vector.shape_cast %42 : vector<1x24x16xf32> to vector<24x16xf32>
    %cst_46 = arith.constant dense<0.000000e+00> : vector<16x16xf32>
    %44 = tpu.matmul %1, %43, %cst_46 {dimension_numbers = #tpu.dot_dimension_numbers<[1], [0], [0], [1], [0, 0, 1, 1], [], []>} : vector<16x24xf32>, vector<24x16xf32>, vector<16x16xf32> -> vector<16x16xf32>
    %c2_47 = arith.constant 2 : index
    %c0_48 = arith.constant 0 : index
    %c0_49 = arith.constant 0 : index
    %45 = vector.load %arg5[%c2_47, %c0_48, %c0_49] : memref<4x1x16xf32, #tpu.memory_space<vmem>>, vector<1x1x16xf32>
    %46 = vector.shape_cast %45 : vector<1x1x16xf32> to vector<1x16xf32>
    %47 = vector.broadcast %46 : vector<1x16xf32> to vector<16x16xf32>
    %48 = arith.addf %44, %47 : vector<16x16xf32>
    %c32_50 = arith.constant 32 : index
    %c0_51 = arith.constant 0 : index
    %49 = vector.load %arg11[%c32_50, %c0_51] : memref<64x16xf32, #tpu.memory_space<vmem>>, vector<16x16xf32>
    tpu.vector_store %arg11[%c32_50, %c0_51], %48 {strides = array<i32>} : memref<64x16xf32, #tpu.memory_space<vmem>>, vector<16x16xf32>,
    %c3 = arith.constant 3 : index
    %c0_52 = arith.constant 0 : index
    %c0_53 = arith.constant 0 : index
    %50 = vector.load %arg2[%c3, %c0_52, %c0_53] : memref<4x32x8xf32, #tpu.memory_space<vmem>>, vector<1x32x8xf32>
    %51 = vector.shape_cast %50 : vector<1x32x8xf32> to vector<32x8xf32>
    %cst_54 = arith.constant dense<0.000000e+00> : vector<16x8xf32>
    %52 = tpu.matmul %0, %51, %cst_54 {dimension_numbers = #tpu.dot_dimension_numbers<[1], [0], [0], [1], [0, 0, 1, 1], [], []>} : vector<16x32xf32>, vector<32x8xf32>, vector<16x8xf32> -> vector<16x8xf32>
    %c3_55 = arith.constant 3 : index
    %c0_56 = arith.constant 0 : index
    %c0_57 = arith.constant 0 : index
    %53 = vector.load %arg3[%c3_55, %c0_56, %c0_57] : memref<4x1x8xf32, #tpu.memory_space<vmem>>, vector<1x1x8xf32>
    %54 = vector.shape_cast %53 : vector<1x1x8xf32> to vector<1x8xf32>
    %55 = vector.broadcast %54 : vector<1x8xf32> to vector<16x8xf32>
    %56 = arith.addf %52, %55 : vector<16x8xf32>
    %c48 = arith.constant 48 : index
    %c0_58 = arith.constant 0 : index
    %57 = vector.load %arg10[%c48, %c0_58] : memref<64x8xf32, #tpu.memory_space<vmem>>, vector<16x8xf32>
    tpu.vector_store %arg10[%c48, %c0_58], %56 {strides = array<i32>} : memref<64x8xf32, #tpu.memory_space<vmem>>, vector<16x8xf32>,
    %c3_59 = arith.constant 3 : index
    %c0_60 = arith.constant 0 : index
    %c0_61 = arith.constant 0 : index
    %58 = vector.load %arg4[%c3_59, %c0_60, %c0_61] : memref<4x24x16xf32, #tpu.memory_space<vmem>>, vector<1x24x16xf32>
    %59 = vector.shape_cast %58 : vector<1x24x16xf32> to vector<24x16xf32>
    %cst_62 = arith.constant dense<0.000000e+00> : vector<16x16xf32>
    %60 = tpu.matmul %1, %59, %cst_62 {dimension_numbers = #tpu.dot_dimension_numbers<[1], [0], [0], [1], [0, 0, 1, 1], [], []>} : vector<16x24xf32>, vector<24x16xf32>, vector<16x16xf32> -> vector<16x16xf32>
    %c3_63 = arith.constant 3 : index
    %c0_64 = arith.constant 0 : index
    %c0_65 = arith.constant 0 : index
    %61 = vector.load %arg5[%c3_63, %c0_64, %c0_65] : memref<4x1x16xf32, #tpu.memory_space<vmem>>, vector<1x1x16xf32>
    %62 = vector.shape_cast %61 : vector<1x1x16xf32> to vector<1x16xf32>
    %63 = vector.broadcast %62 : vector<1x16xf32> to vector<16x16xf32>
    %64 = arith.addf %60, %63 : vector<16x16xf32>
    %c48_66 = arith.constant 48 : index
    %c0_67 = arith.constant 0 : index
    %65 = vector.load %arg11[%c48_66, %c0_67] : memref<64x16xf32, #tpu.memory_space<vmem>>, vector<16x16xf32>
    tpu.vector_store %arg11[%c48_66, %c0_67], %64 {strides = array<i32>} : memref<64x16xf32, #tpu.memory_space<vmem>>, vector<16x16xf32>,
    %c0_68 = arith.constant 0 : index
    %c0_69 = arith.constant 0 : index
    %66 = vector.load %arg10[%c0_68, %c0_69] : memref<64x8xf32, #tpu.memory_space<vmem>>, vector<64x8xf32>
    %c0_70 = arith.constant 0 : index
    %c0_71 = arith.constant 0 : index
    %67 = vector.load %arg11[%c0_70, %c0_71] : memref<64x16xf32, #tpu.memory_space<vmem>>, vector<64x16xf32>
    %68 = vector.extract_strided_slice %67 {offsets = [0, 0], sizes = [64, 8], strides = [1, 1]} : vector<64x16xf32> to vector<64x8xf32>
    %69 = vector.extract_strided_slice %67 {offsets = [0, 8], sizes = [64, 8], strides = [1, 1]} : vector<64x16xf32> to vector<64x8xf32>
    %cst_72 = arith.constant dense<0.000000e+00> : vector<64x64xf32>
    %70 = tpu.matmul %66, %68, %cst_72 {dimension_numbers = #tpu.dot_dimension_numbers<[1], [1], [0], [0], [0, 0, 1, 0], [], []>} : vector<64x8xf32>, vector<64x8xf32>, vector<64x64xf32> -> vector<64x64xf32>
    %c0_73 = arith.constant 0 : index
    %c0_74 = arith.constant 0 : index
    %71 = vector.load %arg8[%c0_73, %c0_74] : memref<64x64xf32, #tpu.memory_space<vmem>>, vector<64x64xf32>
    %72 = arith.addf %70, %71 : vector<64x64xf32>
    %cst_75 = arith.constant dense<0xFF800000> : vector<64xf32>
    %73 = vector.multi_reduction <maximumf>, %72, %cst_75 [1] : vector<64x64xf32> to vector<64xf32>
    %74 = vector.shape_cast %73 : vector<64xf32> to vector<64x1xf32>
    %75 = vector.broadcast %74 : vector<64x1xf32> to vector<64x64xf32>
    %76 = arith.subf %72, %75 : vector<64x64xf32>
    %77 = math.exp %76 : vector<64x64xf32>
    %cst_76 = arith.constant dense<0.000000e+00> : vector<64xf32>
    %78 = vector.multi_reduction <add>, %77, %cst_76 [1] : vector<64x64xf32> to vector<64xf32>
    %79 = vector.shape_cast %78 : vector<64xf32> to vector<64x1xf32>
    %80 = tpu.reciprocal %79 {approx = true} : vector<64x1xf32> -> vector<64x1xf32>
    %81 = arith.mulf %79, %80 : vector<64x1xf32>
    %cst_77 = arith.constant 2.000000e+00 : f32
    %82 = vector.broadcast %cst_77 : f32 to vector<64x1xf32>
    %83 = arith.subf %82, %81 : vector<64x1xf32>
    %84 = arith.mulf %80, %83 : vector<64x1xf32>
    %cst_78 = arith.constant dense<0.000000e+00> : vector<64x8xf32>
    %85 = tpu.matmul %77, %69, %cst_78 {dimension_numbers = #tpu.dot_dimension_numbers<[1], [0], [0], [1], [0, 0, 1, 1], [], []>} : vector<64x64xf32>, vector<64x8xf32>, vector<64x8xf32> -> vector<64x8xf32>
    %86 = vector.broadcast %84 : vector<64x1xf32> to vector<64x8xf32>
    %87 = arith.mulf %85, %86 : vector<64x8xf32>
    %88 = vector.extract_strided_slice %87 {offsets = [0, 0], sizes = [16, 8], strides = [1, 1]} : vector<64x8xf32> to vector<16x8xf32>
    %c0_79 = arith.constant 0 : index
    %c0_80 = arith.constant 0 : index
    %c0_81 = arith.constant 0 : index
    %89 = vector.load %arg6[%c0_79, %c0_80, %c0_81] : memref<4x8x32xf32, #tpu.memory_space<vmem>>, vector<1x8x32xf32>
    %90 = vector.shape_cast %89 : vector<1x8x32xf32> to vector<8x32xf32>
    %cst_82 = arith.constant dense<0.000000e+00> : vector<16x32xf32>
    %91 = tpu.matmul %88, %90, %cst_82 {dimension_numbers = #tpu.dot_dimension_numbers<[1], [0], [0], [1], [0, 0, 1, 1], [], []>} : vector<16x8xf32>, vector<8x32xf32>, vector<16x32xf32> -> vector<16x32xf32>
    %92 = vector.extract_strided_slice %87 {offsets = [16, 0], sizes = [16, 8], strides = [1, 1]} : vector<64x8xf32> to vector<16x8xf32>
    %c1_83 = arith.constant 1 : index
    %c0_84 = arith.constant 0 : index
    %c0_85 = arith.constant 0 : index
    %93 = vector.load %arg6[%c1_83, %c0_84, %c0_85] : memref<4x8x32xf32, #tpu.memory_space<vmem>>, vector<1x8x32xf32>
    %94 = vector.shape_cast %93 : vector<1x8x32xf32> to vector<8x32xf32>
    %cst_86 = arith.constant dense<0.000000e+00> : vector<16x32xf32>
    %95 = tpu.matmul %92, %94, %cst_86 {dimension_numbers = #tpu.dot_dimension_numbers<[1], [0], [0], [1], [0, 0, 1, 1], [], []>} : vector<16x8xf32>, vector<8x32xf32>, vector<16x32xf32> -> vector<16x32xf32>
    %96 = arith.addf %91, %95 : vector<16x32xf32>
    %97 = vector.extract_strided_slice %87 {offsets = [32, 0], sizes = [16, 8], strides = [1, 1]} : vector<64x8xf32> to vector<16x8xf32>
    %c2_87 = arith.constant 2 : index
    %c0_88 = arith.constant 0 : index
    %c0_89 = arith.constant 0 : index
    %98 = vector.load %arg6[%c2_87, %c0_88, %c0_89] : memref<4x8x32xf32, #tpu.memory_space<vmem>>, vector<1x8x32xf32>
    %99 = vector.shape_cast %98 : vector<1x8x32xf32> to vector<8x32xf32>
    %cst_90 = arith.constant dense<0.000000e+00> : vector<16x32xf32>
    %100 = tpu.matmul %97, %99, %cst_90 {dimension_numbers = #tpu.dot_dimension_numbers<[1], [0], [0], [1], [0, 0, 1, 1], [], []>} : vector<16x8xf32>, vector<8x32xf32>, vector<16x32xf32> -> vector<16x32xf32>
    %101 = arith.addf %96, %100 : vector<16x32xf32>
    %102 = vector.extract_strided_slice %87 {offsets = [48, 0], sizes = [16, 8], strides = [1, 1]} : vector<64x8xf32> to vector<16x8xf32>
    %c3_91 = arith.constant 3 : index
    %c0_92 = arith.constant 0 : index
    %c0_93 = arith.constant 0 : index
    %103 = vector.load %arg6[%c3_91, %c0_92, %c0_93] : memref<4x8x32xf32, #tpu.memory_space<vmem>>, vector<1x8x32xf32>
    %104 = vector.shape_cast %103 : vector<1x8x32xf32> to vector<8x32xf32>
    %cst_94 = arith.constant dense<0.000000e+00> : vector<16x32xf32>
    %105 = tpu.matmul %102, %104, %cst_94 {dimension_numbers = #tpu.dot_dimension_numbers<[1], [0], [0], [1], [0, 0, 1, 1], [], []>} : vector<16x8xf32>, vector<8x32xf32>, vector<16x32xf32> -> vector<16x32xf32>
    %106 = arith.addf %101, %105 : vector<16x32xf32>
    %c0_95 = arith.constant 0 : index
    %c0_96 = arith.constant 0 : index
    %107 = vector.load %arg7[%c0_95, %c0_96] : memref<1x32xf32, #tpu.memory_space<vmem>>, vector<1x32xf32>
    %108 = vector.broadcast %107 : vector<1x32xf32> to vector<16x32xf32>
    %109 = arith.addf %106, %108 : vector<16x32xf32>
    %c0_97 = arith.constant 0 : index
    %c0_98 = arith.constant 0 : index
    %110 = vector.load %arg9[%c0_97, %c0_98] : memref<16x32xf32, #tpu.memory_space<vmem>>, vector<16x32xf32>
    tpu.vector_store %arg9[%c0_97, %c0_98], %109 {strides = array<i32>} : memref<16x32xf32, #tpu.memory_space<vmem>>, vector<16x32xf32>,
    return
  }
}

</mosaic_0001>

<bundles_post_ra>
// kernel: cross_attention.1
= control target key start
LH: loop header
LB: loop body
LE: loop exit
PB: predicated region body
PF: predicated region fallthrough
CT: control target
= control target key end

     0   :  { %vm85_vm0 = vcmask 195584   ;;  %s1287_s0 = inlined_call_operand.vmem [shape: f32[16,32], index: 0, kind: input, shape index: {}]   ;;  %s1288_s1 = inlined_call_operand.vmem [shape: f32[16,24], index: 1, kind: input, shape index: {}]   ;;  %s1289_s2 = inlined_call_operand.vmem [shape: f32[4,32,8], index: 2, kind: input, shape index: {}]   ;;  %s1290_s3 = inlined_call_operand.vmem [shape: f32[4,1,8], index: 3, kind: input, shape index: {}]   ;;  %s1291_s4 = inlined_call_operand.vmem [shape: f32[4,24,16], index: 4, kind: input, shape index: {}]   ;;  %s1292_s5 = inlined_call_operand.vmem [shape: f32[4,1,16], index: 5, kind: input, shape index: {}]   ;;  %s1293_s6 = inlined_call_operand.vmem [shape: f32[4,8,32], index: 6, kind: input, shape index: {}]   ;;  %s1294_s7 = inlined_call_operand.vmem [shape: f32[1,32], index: 7, kind: input, shape index: {}]   ;;  %s1295_s8 = inlined_call_operand.vmem [shape: f32[64,64], index: 8, kind: input, shape index: {}]   ;;  %s1296_s9 = inlined_call_operand.hbm [shape: f32[16,32], index: 9, kind: output, shape index: {}]  }
   0x1   :  { %v80_v0 = vld [vmem:[%s1291_s4 + $0x10] sm:$0xff]  ;;  %v79_v1 = vld [vmem:[%s1291_s4 + $0x8] sm:$0xff]  ;;  %v78_v3 = vld [vmem:[%s1291_s4] sm:$0xff] }
   0x2   :  { %105 = vmatpush.msra.mxu2 %v80_v0  ;;  %v806_v2 = vld [vmem:[%s1291_s4 + $0x28] sm:$0xff]  ;;  %v805_v4 = vld [vmem:[%s1291_s4 + $0x20] sm:$0xff]  ;;  %v804_v6 = vld [vmem:[%s1291_s4 + $0x18] sm:$0xff] }
   0x3   :  { %871 = vmatpush.msra.mxu3 %v806_v2  ;;  %v1037_v5 = vld [vmem:[%s1288_s1] sm:$0xff]  ;;  %v800_v7 = vld [vmem:[%s1289_s2 + $0x38] sm:$0xff]  ;;  %v1048_v8 = vld [vmem:[%s1288_s1 + $0x8] sm:$0xff] }
   0x4   :  { %106 = vmatpush.msra.mxu2 %v79_v1  ;;  %v819_v9 = vld [vmem:[%s1291_s4 + $0x40] sm:$0xff]  ;;  %v799_v10 = vld [vmem:[%s1289_s2 + $0x30] sm:$0xff]  ;;  %v798_v11 = vld [vmem:[%s1289_s2 + $0x28] sm:$0xff] }
   0x5   :  { %872 = vmatpush.msra.mxu3 %v805_v4  ;;  %v818_v12 = vld [vmem:[%s1291_s4 + $0x38] sm:$0xff]  ;;  %v817_v13 = vld [vmem:[%s1291_s4 + $0x30] sm:$0xff] }
   0x6   :  { %107 = vmatpush.msra.mxu2 %v78_v3 }
   0x7   :  { %795 = vmatmul.msk.f32.vlgmr.msra.gmra.mxu2 %vm85_vm0, %v1037_v5  ;;  %873 = vmatpush.msra.mxu3 %v804_v6 }
   0x8   :  { %140 = vmatpush.msrb.mxu2 %v800_v7  ;;  %809 = vmatmul.msk.f32.vlgmr.msra.gmra.mxu3 %vm85_vm0, %v1048_v8 }
   0x9   :  { %244 = vmatpush.msrb.mxu3 %v819_v9 }
   0xa   :  { %141 = vmatpush.msrb.mxu2 %v799_v10 }
   0xb   :  { %14 = vsyncpa [#allocation5], 0  ;;  %v797_v14 = vld [vmem:[%s1289_s2 + $0x20] sm:$0xff]  ;;  %245 = vmatpush.msrb.mxu3 %v818_v12  ;;  %vm45_vm1 = vcmask 261120   ;;  %v832_v16 = vld [vmem:[%s1291_s4 + $0x58] sm:$0xff]  ;;  %vm115_vm2 = vcmask 130048  }
   0xc   :  { %142 = vmatpush.msrb.mxu2 %v798_v11  ;;  %v33_v15 = vld [vmem:[%s1287_s0] sm:$0xff]  ;;  %v831_v17 = vld [vmem:[%s1291_s4 + $0x50] sm:$0xff]  ;;  %v40_v18 = vld [vmem:[%s1289_s2 + $0x18] sm:$0xff]  ;;  %vm75_vm3 = vcmask 64512   ;;  %s965_s1 = smov 120   ;;  %vm438_vm4 = vcmask 523264  }
   0xd   :  { %246 = vmatpush.msrb.mxu3 %v817_v13  ;;  %v39_v19 = vld [vmem:[%s1289_s2 + $0x10] sm:$0xff]  ;;  %v830_v20 = vld [vmem:[%s1291_s4 + $0x48] sm:$0xff]  ;;  %64 = vmatpush.msra.mxu0 %v40_v18  ;;  %v37_v23 = vld [vmem:[%s1289_s2] sm:$0xff]  ;;  %s781_s18 = sshll.u32 %s1296_s9, 4  ;;  %s968_s19 = smov 8   ;;  %s782_s18 = int_to_ptr.hbm [resolvable:$true] %s781_s18 }
   0xe   :  { %143 = vmatpush.msrb.mxu2 %v797_v14  ;;  %v38_v21 = vld [vmem:[%s1289_s2 + $0x8] sm:$0xff]  ;;  %v813_v24 = vld [vmem:[%s1289_s2 + $0x58] sm:$0xff]  ;;  %v812_v25 = vld [vmem:[%s1289_s2 + $0x50] sm:$0xff] }
   0xf   :  { %796 = vmatmul.msk.f32.gmra.mxu2 %vm85_vm0, %v1048_v8  ;;  %65 = vmatpush.msra.mxu0 %v39_v19  ;;  %v34_v22 = vld [vmem:[%s1287_s0 + $0x8] sm:$0xff]  ;;  %v810_v27 = vld [vmem:[%s1289_s2 + $0x40] sm:$0xff]  ;;  %v826_v28 = vld [vmem:[%s1289_s2 + $0x78] sm:$0xff]  ;;  %s966_s0 = smov [#allocation4]  }
  0x10   :  { %175 = vmatpush.msra.mxu2 %v806_v2  ;;  %821 = vmatmul.msk.f32.vlgmr.msrb.gmra.mxu3 %vm85_vm0, %v1037_v5  ;;  %v811_v26 = vld [vmem:[%s1289_s2 + $0x48] sm:$0xff]  ;;  %v825_v29 = vld [vmem:[%s1289_s2 + $0x70] sm:$0xff]  ;;  %v823_v31 = vld [vmem:[%s1289_s2 + $0x60] sm:$0xff]  ;;  %s779_s16 = sshll.u32 %s966_s0, 4  ;;  %s780_s16 = int_to_ptr.vmem [resolvable:$true] %s779_s16 }
  0x11   :  { %66 = vmatpush.msra.mxu0 %v38_v21  ;;  %v824_v30 = vld [vmem:[%s1289_s2 + $0x68] sm:$0xff]  ;;  %v898_v32 = vld [vmem:[%s1292_s5] ss:$0 sm:$0xff]  ;;  %v899_v33 = vld [vmem:[%s1292_s5 + $0x1] ss:$0 sm:$0xff] }
  0x12   :  { %176 = vmatpush.msra.mxu2 %v805_v4  ;;  %v901_v38 = vld [vmem:[%s1292_s5 + $0x2] ss:$0 sm:$0xff]  ;;  %v900_v43 = vld [vmem:[%s1290_s3 + $0x1] ss:$0 sm:$0xff]  ;;  %v902_v55 = vld [vmem:[%s1292_s5 + $0x3] ss:$0 sm:$0xff] }
  0x13   :  { %67 = vmatpush.msra.mxu0 %v37_v23  ;;  %v903_v61 = vld [vmem:[%s1290_s3] ss:$0 sm:$0xff]  ;;  %v904_v7 = vld [vmem:[%s1290_s3 + $0x2] ss:$0 sm:$0xff] }
  0x14   :  { %177 = vmatpush.msra.mxu2 %v804_v6  ;;  %793 = vmatmul.msk.f32.vlgmr.msra.gmra.mxu0 %vm45_vm1, %v33_v15 }
  0x15   :  { %209 = vmatpush.msrb.mxu0 %v813_v24 }
  0x17   :  { %802 = vmatmul.msk.f32.vlgmr.msrb.gmra.mxu2 %vm45_vm1, %v33_v15  ;;  %210 = vmatpush.msrb.mxu0 %v812_v25 }
  0x18   :  { %822 = vmatmul.msk.f32.gmra.mxu3 %vm85_vm0, %v1048_v8  ;;  %313 = vmatpush.msrb.mxu2 %v832_v16 }
  0x19   :  { %211 = vmatpush.msrb.mxu0 %v811_v26 }
  0x1a   :  { %314 = vmatpush.msrb.mxu2 %v831_v17 }
  0x1b   :  { %212 = vmatpush.msrb.mxu0 %v810_v27 }
  0x1c   :  { %315 = vmatpush.msrb.mxu2 %v830_v20  ;;  %794 = vmatmul.msk.f32.gmra.mxu0 %vm45_vm1, %v34_v22 }
  0x1d   :  { %278 = vmatpush.msra.mxu0 %v826_v28 }
  0x1f   :  { %803 = vmatmul.msk.f32.gmra.mxu2 %vm45_vm1, %v34_v22  ;;  %279 = vmatpush.msra.mxu0 %v825_v29 }
  0x21   :  { %280 = vmatpush.msra.mxu0 %v824_v30 }
  0x23   :  { %281 = vmatpush.msra.mxu0 %v823_v31 }
  0x24   :  { %815 = vmatmul.msk.f32.vlgmr.msrb.gmra.mxu0 %vm45_vm1, %v33_v15 }
  0x27   :  { %808 = vmatmul.msk.f32.vlgmr.msra.gmra.mxu2 %vm85_vm0, %v1037_v5 }
  0x2c   :  { %816 = vmatmul.msk.f32.gmra.mxu0 %vm45_vm1, %v34_v22 }
  0x2f   :  { %834 = vmatmul.msk.f32.vlgmr.msrb.gmra.mxu2 %vm85_vm0, %v1037_v5 }
  0x34   :  { %828 = vmatmul.msk.f32.vlgmr.msra.gmra.mxu0 %vm45_vm1, %v33_v15  ;;  %v905_v15 = vld [vmem:[%s1290_s3 + $0x3] ss:$0 sm:$0xff] }
  0x37   :  { %835 = vmatmul.msk.f32.gmra.mxu2 %vm85_vm0, %v1048_v8 }
  0x3c   :  { %829 = vmatmul.msk.f32.gmra.mxu0 %vm45_vm1, %v34_v22 }
  0x8a   :  { %v109_v34 = vpop.f32.mrf.mxu2 }
  0x8b   :  { %v110_v35 = vadd.f32 %v898_v32, %v109_v34  ;;  %v182_v36 = vpop.f32.mrf.mxu3 }
  0x8c   :  { %v183_v37 = vadd.f32 %v899_v33, %v182_v36  ;;  %v341_v36 = vld [vmem:[%s1295_s8] sm:$0xff] }
  0x8d   :  { %116 = vst.msk [vmem:[#allocation3] sm:$0xff] %vm115_vm2, %v110_v35 }
  0x8e   :  { %186 = vst.msk [vmem:[#allocation3 + $0x18] sm:$0xff] %vm115_vm2, %v183_v37 }
  0x91   :  { %v69_v62 = vpop.f32.mrf.mxu0 }
  0x92   :  { %v112_v39 = vpop.f32.mrf.mxu2  ;;  %v70_v63 = vadd.f32 %v903_v61, %v69_v62  ;;  %v348_v62 = vld [vmem:[%s1295_s8 + $0x38] sm:$0xff] }
  0x93   :  { %v113_v40 = vadd.f32 %v898_v32, %v112_v39  ;;  %v248_v41 = vpop.f32.mrf.mxu3 }
  0x94   :  { %v249_v42 = vadd.f32 %v901_v38, %v248_v41  ;;  %76 = vst.msk [vmem:[#allocation2] sm:$0xff] %vm75_vm3, %v70_v63  ;;  %v333_v13 = vld [vmem:[#allocation3] sm:$0xff] }
  0x95   :  { %117 = vst.msk [vmem:[#allocation3 + $0x8] sm:$0xff] %vm115_vm2, %v113_v40  ;;  %v336_v57 = vld [vmem:[#allocation3 + $0x18] sm:$0xff]  ;;  %v342_v40 = vld [vmem:[%s1295_s8 + $0x8] sm:$0xff] }
  0x96   :  { %254 = vst.msk [vmem:[#allocation3 + $0x20] sm:$0xff] %vm115_vm2, %v249_v42 }
  0x99   :  { %v72_v2 = vpop.f32.mrf.mxu0 }
  0x9a   :  { %v145_v44 = vpop.f32.mrf.mxu2  ;;  %v73_v3 = vadd.f32 %v903_v61, %v72_v2  ;;  %v344_v2 = vld [vmem:[%s1295_s8 + $0x18] sm:$0xff] }
  0x9b   :  { %v146_v45 = vadd.f32 %v900_v43, %v145_v44  ;;  %v251_v46 = vpop.f32.mrf.mxu3  ;;  %v325_v14 = vld [vmem:[#allocation2] sm:$0xff]  ;;  %v343_v44 = vld [vmem:[%s1295_s8 + $0x10] sm:$0xff] }
  0x9c   :  { %v252_v47 = vadd.f32 %v901_v38, %v251_v46  ;;  %77 = vst.msk [vmem:[#allocation2 + $0x8] sm:$0xff] %vm75_vm3, %v73_v3  ;;  %v1186_v10 = vld [vmem:[#allocation3 + $0x8] sm:$0xff] }
  0x9d   :  { %151 = vst.msk [vmem:[#allocation2 + $0x10] sm:$0xff] %vm75_vm3, %v146_v45  ;;  %v337_v50 = vld [vmem:[#allocation3 + $0x20] sm:$0xff] }
  0x9e   :  { %255 = vst.msk [vmem:[#allocation3 + $0x28] sm:$0xff] %vm115_vm2, %v252_v47 }
  0xa1   :  { %v214_v8 = vpop.f32.mrf.mxu0 }
  0xa2   :  { %v148_v48 = vpop.f32.mrf.mxu2  ;;  %v215_v9 = vadd.f32 %v904_v7, %v214_v8 }
  0xa3   :  { %v149_v49 = vadd.f32 %v900_v43, %v148_v48  ;;  %v326_v16 = vld [vmem:[#allocation2 + $0x8] sm:$0xff] }
  0xa4   :  { %220 = vst.msk [vmem:[#allocation2 + $0x20] sm:$0xff] %vm75_vm3, %v215_v9  ;;  %v327_v21 = vld [vmem:[#allocation2 + $0x10] sm:$0xff] }
  0xa5   :  { %152 = vst.msk [vmem:[#allocation2 + $0x18] sm:$0xff] %vm75_vm3, %v149_v49  ;;  %v338_v51 = vld [vmem:[#allocation3 + $0x28] sm:$0xff]  ;;  %v345_v49 = vld [vmem:[%s1295_s8 + $0x20] sm:$0xff] }
  0xa6   :  { %v883_v52 = vpack.i.bf16 %v337_v50, %v338_v51 }
  0xa8   :  { %884 = vrot.lane.b32.xlu1 %v883_v52, %s965_s1  ;;  %v893_v52 = vpack.i.bf16 %v333_v13, %v1186_v10 }
  0xa9   :  { %v217_v11 = vpop.f32.mrf.mxu0 }
  0xaa   :  { %v179_v53 = vpop.f32.mrf.mxu2  ;;  %v218_v12 = vadd.f32 %v904_v7, %v217_v11 }
  0xab   :  { %v180_v54 = vadd.f32 %v899_v33, %v179_v53  ;;  %v329_v23 = vld [vmem:[#allocation2 + $0x20] sm:$0xff] }
  0xac   :  { %221 = vst.msk [vmem:[#allocation2 + $0x28] sm:$0xff] %vm75_vm3, %v218_v12  ;;  %v328_v22 = vld [vmem:[#allocation2 + $0x18] sm:$0xff] }
  0xad   :  { %185 = vst.msk [vmem:[#allocation3 + $0x10] sm:$0xff] %vm115_vm2, %v180_v54  ;;  %v346_v54 = vld [vmem:[%s1295_s8 + $0x28] sm:$0xff] }
  0xb1   :  { %v283_v17 = vpop.f32.mrf.mxu0 }
  0xb2   :  { %v317_v56 = vpop.f32.mrf.mxu2  ;;  %v284_v18 = vadd.f32 %v905_v15, %v283_v17 }
  0xb3   :  { %v318_v58 = vadd.f32 %v902_v55, %v317_v56  ;;  %v330_v24 = vld [vmem:[#allocation2 + $0x28] sm:$0xff] }
  0xb4   :  { %v335_v59 = vld [vmem:[#allocation3 + $0x10] sm:$0xff]  ;;  %289 = vst.msk [vmem:[#allocation2 + $0x30] sm:$0xff] %vm75_vm3, %v284_v18 }
  0xb5   :  { %323 = vst.msk [vmem:[#allocation3 + $0x30] sm:$0xff] %vm115_vm2, %v318_v58  ;;  %v888_v60 = vpack.i.bf16 %v335_v59, %v336_v57  ;;  %v347_v58 = vld [vmem:[%s1295_s8 + $0x30] sm:$0xff] }
  0xb7   :  { %889 = vrot.lane.b32.xlu1 %v888_v60, %s965_s1 }
  0xb9   :  { %v286_v19 = vpop.f32.mrf.mxu0 }
  0xba   :  { %v320_v0 = vpop.f32.mrf.mxu2  ;;  %v287_v20 = vadd.f32 %v905_v15, %v286_v19 }
  0xbb   :  { %v321_v1 = vadd.f32 %v902_v55, %v320_v0  ;;  %v331_v25 = vld [vmem:[#allocation2 + $0x30] sm:$0xff] }
  0xbc   :  { %v339_v5 = vld [vmem:[#allocation3 + $0x30] sm:$0xff]  ;;  %290 = vst.msk [vmem:[#allocation2 + $0x38] sm:$0xff] %vm75_vm3, %v287_v20 }
  0xbd   :  { %324 = vst.msk [vmem:[#allocation3 + $0x38] sm:$0xff] %vm115_vm2, %v321_v1 }
  0xc3   :  { %v332_v26 = vld [vmem:[#allocation2 + $0x38] sm:$0xff] }
  0xc4   :  { %v340_v4 = vld [vmem:[#allocation3 + $0x38] sm:$0xff] }
  0xc5   :  { %836 = vmatpush.xpose.msk.msra.mxu1 %vm75_vm3, %v340_v4  ;;  %v878_v6 = vpack.i.bf16 %v339_v5, %v340_v4 }
  0xc7   :  { %879 = vrot.lane.b32.xlu0 %v878_v6, %s965_s1 }
  0xc9   :  { %837 = vmatpush.xpose.msk.msra.mxu1 %vm75_vm3, %v339_v5 }
  0xcd   :  { %838 = vmatpush.xpose.msk.msra.mxu1 %vm75_vm3, %v338_v51 }
  0xd1   :  { %839 = vmatpush.xpose.msk.msra.mxu1 %vm75_vm3, %v337_v50 }
  0xd5   :  { %840 = vmatpush.xpose.msk.msra.mxu1 %vm75_vm3, %v336_v57 }
  0xd9   :  { %841 = vmatpush.xpose.msk.msra.mxu1 %vm75_vm3, %v335_v59 }
  0xdd   :  { %842 = vmatpush.xpose.msk.msra.mxu1 %vm75_vm3, %v1186_v10 }
  0xe1   :  { %843 = vmatpush.xpose.msk.msra.mxu1 %vm75_vm3, %v333_v13 }
  0xe4   :  { %844 = vmatmul.msk.f32.vlgmr.msra.gmra.mxu1 %vm75_vm3, %v325_v14 }
  0xec   :  { %845 = vmatmul.msk.f32.gmra.mxu1 %vm75_vm3, %v326_v16 }
  0xf4   :  { %846 = vmatmul.msk.f32.gmra.mxu1 %vm75_vm3, %v327_v21 }
  0xfc   :  { %847 = vmatmul.msk.f32.gmra.mxu1 %vm75_vm3, %v328_v22 }
 0x104   :  { %848 = vmatmul.msk.f32.gmra.mxu1 %vm75_vm3, %v329_v23 }
 0x10c   :  { %849 = vmatmul.msk.f32.gmra.mxu1 %vm75_vm3, %v330_v24 }
 0x114   :  { %850 = vmatmul.msk.f32.gmra.mxu1 %vm75_vm3, %v331_v25 }
 0x11a   :  { %v885_v27 = vpop.permute.xlu1 %884 }
 0x11b   :  { %v886_v31 = vunpack.i.l.bf16 %v885_v27  ;;  %v887_v33 = vunpack.i.h.bf16 %v885_v27 }
 0x11c   :  { %851 = vmatmul.msk.f32.gmra.mxu1 %vm75_vm3, %v332_v26 }
 0x129   :  { %v890_v32 = vpop.permute.xlu1 %889 }
 0x12a   :  { %v891_v34 = vunpack.i.l.bf16 %v890_v32  ;;  %v892_v35 = vunpack.i.h.bf16 %v890_v32 }
 0x139   :  { %v880_v28 = vpop.permute.xlu0 %879 }
 0x13a   :  { %v881_v29 = vunpack.i.l.bf16 %v880_v28  ;;  %v882_v30 = vunpack.i.h.bf16 %v880_v28 }
 0x13c   :  { %599 = vmatpush.msra.mxu3 %v881_v29 }
 0x13e   :  { %600 = vmatpush.msra.mxu3 %v882_v30 }
 0x140   :  { %601 = vmatpush.msra.mxu3 %v886_v31 }
 0x142   :  { %602 = vmatpush.msra.mxu3 %v887_v33 }
 0x144   :  { %603 = vmatpush.msra.mxu3 %v891_v34 }
 0x146   :  { %604 = vmatpush.msra.mxu3 %v892_v35 }
 0x161   :  { %v414_v37 = vpop.f32.mrf.mxu1 }
 0x162   :  { %v415_v38 = vadd.f32 %v414_v37, %v341_v36 }
 0x164   :  { %v439_v39 = vsel %vm438_vm4, %v415_v38, -inf }
 0x165   :  { %440 = vmax.xlane.f32.xlu0 %v439_v39 }
 0x169   :  { %v417_v41 = vpop.f32.mrf.mxu1 }
 0x16a   :  { %v418_v42 = vadd.f32 %v417_v41, %v342_v40 }
 0x16c   :  { %v442_v43 = vsel %vm438_vm4, %v418_v42, -inf }
 0x16d   :  { %443 = vmax.xlane.f32.xlu2 %v442_v43 }
 0x171   :  { %v420_v45 = vpop.f32.mrf.mxu1 }
 0x172   :  { %v421_v46 = vadd.f32 %v420_v45, %v343_v44 }
 0x174   :  { %v445_v47 = vsel %vm438_vm4, %v421_v46, -inf }
 0x175   :  { %446 = vmax.xlane.f32.xlu1 %v445_v47 }
 0x179   :  { %v423_v48 = vpop.f32.mrf.mxu1 }
 0x17a   :  { %v424_v3 = vadd.f32 %v423_v48, %v344_v2  ;;  %v640_v48 = vld [vmem:[%s1293_s6] sm:$0xff] }
 0x17b   :  { %693 = vmatpush.msra.mxu2 %v640_v48 }
 0x17c   :  { %v448_v4 = vsel %vm438_vm4, %v424_v3, -inf }
 0x181   :  { %v426_v50 = vpop.f32.mrf.mxu1 }
 0x182   :  { %v427_v51 = vadd.f32 %v426_v50, %v345_v49  ;;  %v860_v50 = vld [vmem:[%s1293_s6 + $0x8] sm:$0xff] }
 0x183   :  { %664 = vmatpush.msrb.mxu0 %v860_v50 }
 0x184   :  { %v451_v53 = vsel %vm438_vm4, %v427_v51, -inf }
 0x185   :  { %894 = vrot.lane.b32.xlu2 %v893_v52, %s965_s1  ;;  %452 = vmax.xlane.f32.xlu0 %v451_v53 }
 0x189   :  { %v429_v55 = vpop.f32.mrf.mxu1 }
 0x18a   :  { %v430_v56 = vadd.f32 %v429_v55, %v346_v54 }
 0x18c   :  { %v454_v57 = vsel %vm438_vm4, %v430_v56, -inf }
 0x18d   :  { %455 = vmax.xlane.f32.xlu0 %v454_v57 }
 0x191   :  { %v432_v59 = vpop.f32.mrf.mxu1 }
 0x192   :  { %v433_v60 = vadd.f32 %v432_v59, %v347_v58 }
 0x194   :  { %v457_v61 = vsel %vm438_vm4, %v433_v60, -inf }
 0x195   :  { %458 = vmax.xlane.f32.xlu1 %v457_v61 }
 0x199   :  { %v435_v63 = vpop.f32.mrf.mxu1 }
 0x19a   :  { %v1234_v0 = vadd.f32 %v435_v63, %v348_v62 }
 0x19c   :  { %v460_v1 = vsel %vm438_vm4, %v1234_v0, -inf }
 0x19d   :  { %461 = vmax.xlane.f32.xlu0 %v460_v1 }
 0x1ae   :  { %449 = vmax.xlane.f32.xlu2 %v448_v4 }
 0x1d8   :  { %v441_v5 = vpop.xlane.xlu0 %440 }
 0x1d9   :  { %v463_v6 = vsub.f32 %v415_v38, %v441_v5 }
 0x1db   :  { %v471_v7 = vmul.f32 1.442695, %v463_v6 }
 0x1dd   :  { %907 = vpow2.f32 %v471_v7  ;;  %v865_v7 = vld [vmem:[%s1293_s6 + $0x10] sm:$0xff] }
 0x1de   :  { %724 = vmatpush.msra.mxu0 %v865_v7 }
 0x1e0   :  { %v444_v8 = vpop.xlane.xlu2 %443 }
 0x1e1   :  { %v464_v9 = vsub.f32 %v418_v42, %v444_v8  ;;  %v868_v8 = vld [vmem:[%s1293_s6 + $0x18] sm:$0xff] }
 0x1e2   :  { %757 = vmatpush.msrb.mxu2 %v868_v8 }
 0x1e3   :  { %v908_v10 = vpop.eup %907  ;;  %v473_v11 = vmul.f32 1.442695, %v464_v9 }
 0x1e4   :  { %v487_v12 = vsel %vm438_vm4, %v908_v10, 0.0 }
 0x1e5   :  { %909 = vpow2.f32 %v473_v11  ;;  %488 = vadd.xlane.f32.xlu1 %v487_v12 }
 0x1e8   :  { %v447_v13 = vpop.xlane.xlu1 %446  ;;  %v895_v14 = vpop.permute.xlu2 %894 }
 0x1e9   :  { %v465_v15 = vsub.f32 %v421_v46, %v447_v13  ;;  %v896_v16 = vunpack.i.l.bf16 %v895_v14  ;;  %v897_v19 = vunpack.i.h.bf16 %v895_v14 }
 0x1eb   :  { %v910_v17 = vpop.eup %909  ;;  %v475_v18 = vmul.f32 1.442695, %v465_v15  ;;  %605 = vmatpush.msra.mxu3 %v896_v16 }
 0x1ec   :  { %v490_v20 = vsel %vm438_vm4, %v910_v17, 0.0 }
 0x1ed   :  { %911 = vpow2.f32 %v475_v18  ;;  %606 = vmatpush.msra.mxu3 %v897_v19  ;;  %491 = vadd.xlane.f32.xlu0 %v490_v20 }
 0x1ee   :  { %852 = vmatmul.msk.f32.vlgmr.msra.gmra.mxu3 %vm438_vm4, %v908_v10 }
 0x1f3   :  { %v912_v21 = vpop.eup %911 }
 0x1f4   :  { %v493_v22 = vsel %vm438_vm4, %v912_v21, 0.0 }
 0x1f5   :  { %494 = vadd.xlane.f32.xlu2 %v493_v22 }
 0x1f6   :  { %853 = vmatmul.msk.f32.gmra.mxu3 %vm438_vm4, %v910_v17 }
 0x1f8   :  { %v453_v23 = vpop.xlane.xlu0 %452 }
 0x1f9   :  { %v467_v24 = vsub.f32 %v427_v51, %v453_v23 }
 0x1fb   :  { %v479_v25 = vmul.f32 1.442695, %v467_v24 }
 0x1fd   :  { %913 = vpow2.f32 %v479_v25 }
 0x1fe   :  { %854 = vmatmul.msk.f32.gmra.mxu3 %vm438_vm4, %v912_v21 }
 0x200   :  { %v456_v28 = vpop.xlane.xlu0 %455 }
 0x201   :  { %v468_v31 = vsub.f32 %v430_v56, %v456_v28 }
 0x203   :  { %v914_v26 = vpop.eup %913  ;;  %v481_v33 = vmul.f32 1.442695, %v468_v31 }
 0x204   :  { %v499_v27 = vsel %vm438_vm4, %v914_v26, 0.0 }
 0x205   :  { %500 = vadd.xlane.f32.xlu0 %v499_v27 }
 0x208   :  { %v459_v29 = vpop.xlane.xlu1 %458 }
 0x209   :  { %v469_v30 = vsub.f32 %v433_v60, %v459_v29 }
 0x20b   :  { %v483_v32 = vmul.f32 1.442695, %v469_v30 }
 0x20d   :  { %915 = vpow2.f32 %v483_v32 }
 0x20e   :  { %917 = vpow2.f32 %v481_v33 }
 0x210   :  { %v462_v38 = vpop.xlane.xlu0 %461 }
 0x211   :  { %v470_v41 = vsub.f32 %v1234_v0, %v462_v38 }
 0x213   :  { %v916_v34 = vpop.eup %915  ;;  %v485_v43 = vmul.f32 1.442695, %v470_v41 }
 0x214   :  { %v505_v35 = vsel %vm438_vm4, %v916_v34, 0.0  ;;  %v918_v36 = vpop.eup %917 }
 0x215   :  { %506 = vadd.xlane.f32.xlu2 %v505_v35  ;;  %v502_v37 = vsel %vm438_vm4, %v918_v36, 0.0 }
 0x21d   :  { %503 = vadd.xlane.f32.xlu2 %v502_v37 }
 0x221   :  { %v450_v39 = vpop.xlane.xlu2 %449 }
 0x222   :  { %v466_v40 = vsub.f32 %v424_v3, %v450_v39 }
 0x224   :  { %v477_v42 = vmul.f32 1.442695, %v466_v40 }
 0x226   :  { %919 = vpow2.f32 %v477_v42 }
 0x227   :  { %921 = vpow2.f32 %v485_v43 }
 0x22c   :  { %v920_v44 = vpop.eup %919 }
 0x22d   :  { %855 = vmatmul.msk.f32.gmra.mxu3 %vm438_vm4, %v920_v44  ;;  %v496_v45 = vsel %vm438_vm4, %v920_v44, 0.0  ;;  %v922_v46 = vpop.eup %921 }
 0x22e   :  { %497 = vadd.xlane.f32.xlu1 %v496_v45  ;;  %v508_v47 = vsel %vm438_vm4, %v922_v46, 0.0 }
 0x235   :  { %856 = vmatmul.msk.f32.gmra.mxu3 %vm438_vm4, %v914_v26 }
 0x236   :  { %509 = vadd.xlane.f32.xlu1 %v508_v47 }
 0x23d   :  { %857 = vmatmul.msk.f32.gmra.mxu3 %vm438_vm4, %v918_v36 }
 0x245   :  { %858 = vmatmul.msk.f32.gmra.mxu3 %vm438_vm4, %v916_v34 }
 0x24d   :  { %859 = vmatmul.msk.f32.gmra.mxu3 %vm438_vm4, %v922_v46 }
 0x258   :  { %v489_v49 = vpop.xlane.xlu1 %488 }
 0x259   :  { %923 = vrcp.f32 %v489_v49 }
 0x25f   :  { %v924_v52 = vpop.eup %923 }
 0x260   :  { %v492_v51 = vpop.xlane.xlu0 %491  ;;  %v519_v53 = vmul.f32 %v924_v52, %v489_v49 }
 0x261   :  { %925 = vrcp.f32 %v492_v51 }
 0x262   :  { %v527_v54 = vsub.f32 2.0, %v519_v53 }
 0x264   :  { %v535_v58 = vmul.f32 %v924_v52, %v527_v54 }
 0x267   :  { %v926_v56 = vpop.eup %925 }
 0x268   :  { %v495_v55 = vpop.xlane.xlu2 %494  ;;  %v520_v57 = vmul.f32 %v926_v56, %v492_v51  ;;  %v906_v51 = vld [vmem:[%s1294_s7] ss:$0 sm:$0xff]  ;;  %s967_s7 = smov 128  }
 0x269   :  { %927 = vrcp.f32 %v495_v55 }
 0x26a   :  { %v528_v61 = vsub.f32 2.0, %v520_v57 }
 0x26c   :  { %v536_v0 = vmul.f32 %v926_v56, %v528_v61 }
 0x26f   :  { %v928_v62 = vpop.eup %927 }
 0x270   :  { %v521_v63 = vmul.f32 %v928_v62, %v495_v55 }
 0x271   :  { %v608_v59 = vpop.f32.mrf.mxu3 }
 0x272   :  { %v632_v60 = vmul.f32 %v608_v59, %v535_v58  ;;  %v529_v3 = vsub.f32 2.0, %v521_v63 }
 0x274   :  { %863 = vmatmul.msk.f32.vlgmr.msra.gmra.mxu2 %vm75_vm3, %v632_v60  ;;  %v537_v4 = vmul.f32 %v928_v62, %v529_v3 }
 0x278   :  { %v501_v11 = vpop.xlane.xlu0 %500 }
 0x279   :  { %v611_v1 = vpop.f32.mrf.mxu3 }
 0x27a   :  { %v633_v2 = vmul.f32 %v611_v1, %v536_v0 }
 0x27c   :  { %864 = vmatmul.msk.f32.gmra.mxu2 %vm75_vm3, %v633_v2 }
 0x281   :  { %v614_v5 = vpop.f32.mrf.mxu3 }
 0x282   :  { %v634_v6 = vmul.f32 %v614_v5, %v537_v4 }
 0x284   :  { %861 = vmatmul.msk.f32.vlgmr.msrb.gmra.mxu0 %vm75_vm3, %v634_v6 }
 0x288   :  { %v507_v9 = vpop.xlane.xlu2 %506 }
 0x290   :  { %v504_v14 = vpop.xlane.xlu2 %503 }
 0x2a1   :  { %v498_v10 = vpop.xlane.xlu1 %497 }
 0x2a2   :  { %929 = vrcp.f32 %v498_v10 }
 0x2a3   :  { %931 = vrcp.f32 %v501_v11 }
 0x2a4   :  { %933 = vrcp.f32 %v504_v14 }
 0x2a5   :  { %935 = vrcp.f32 %v507_v9 }
 0x2a8   :  { %v930_v12 = vpop.eup %929 }
 0x2a9   :  { %v522_v13 = vmul.f32 %v930_v12, %v498_v10  ;;  %v932_v16 = vpop.eup %931  ;;  %v510_v28 = vpop.xlane.xlu1 %509 }
 0x2aa   :  { %v523_v17 = vmul.f32 %v932_v16, %v501_v11  ;;  %v934_v22 = vpop.eup %933  ;;  %937 = vrcp.f32 %v510_v28 }
 0x2ab   :  { %v530_v15 = vsub.f32 2.0, %v522_v13  ;;  %v524_v23 = vmul.f32 %v934_v22, %v504_v14  ;;  %v936_v29 = vpop.eup %935 }
 0x2ac   :  { %v531_v21 = vsub.f32 2.0, %v523_v17  ;;  %v525_v30 = vmul.f32 %v936_v29, %v507_v9 }
 0x2ad   :  { %v538_v18 = vmul.f32 %v930_v12, %v530_v15  ;;  %v532_v27 = vsub.f32 2.0, %v524_v23 }
 0x2ae   :  { %v539_v24 = vmul.f32 %v932_v16, %v531_v21  ;;  %v533_v34 = vsub.f32 2.0, %v525_v30 }
 0x2af   :  { %v540_v31 = vmul.f32 %v934_v22, %v532_v27 }
 0x2b0   :  { %v617_v19 = vpop.f32.mrf.mxu3  ;;  %v938_v35 = vpop.eup %937  ;;  %v541_v37 = vmul.f32 %v936_v29, %v533_v34 }
 0x2b1   :  { %v635_v20 = vmul.f32 %v617_v19, %v538_v18  ;;  %v526_v36 = vmul.f32 %v938_v35, %v510_v28 }
 0x2b3   :  { %862 = vmatmul.msk.f32.gmra.mxu0 %vm75_vm3, %v635_v20  ;;  %v534_v40 = vsub.f32 2.0, %v526_v36 }
 0x2b5   :  { %v542_v41 = vmul.f32 %v938_v35, %v534_v40 }
 0x2b8   :  { %v620_v25 = vpop.f32.mrf.mxu3 }
 0x2b9   :  { %v636_v26 = vmul.f32 %v620_v25, %v539_v24 }
 0x2bb   :  { %866 = vmatmul.msk.f32.vlgmr.msra.gmra.mxu0 %vm75_vm3, %v636_v26 }
 0x2c0   :  { %v623_v32 = vpop.f32.mrf.mxu3 }
 0x2c1   :  { %v637_v33 = vmul.f32 %v623_v32, %v540_v31 }
 0x2c3   :  { %867 = vmatmul.msk.f32.gmra.mxu0 %vm75_vm3, %v637_v33 }
 0x2c8   :  { %v626_v38 = vpop.f32.mrf.mxu3 }
 0x2c9   :  { %v638_v39 = vmul.f32 %v626_v38, %v541_v37 }
 0x2cb   :  { %869 = vmatmul.msk.f32.vlgmr.msrb.gmra.mxu2 %vm75_vm3, %v638_v39 }
 0x2d0   :  { %v629_v42 = vpop.f32.mrf.mxu3 }
 0x2d1   :  { %v639_v43 = vmul.f32 %v629_v42, %v542_v41 }
 0x2d3   :  { %870 = vmatmul.msk.f32.gmra.mxu2 %vm75_vm3, %v639_v43 }
 0x2f7   :  { %v695_v45 = vpop.f32.mrf.mxu2 }
 0x2ff   :  { %v698_v47 = vpop.f32.mrf.mxu2 }
 0x301   :  { %v666_v44 = vpop.f32.mrf.mxu0 }
 0x302   :  { %v696_v49 = vadd.f32 %v695_v45, %v666_v44 }
 0x330   :  { %v669_v46 = vpop.f32.mrf.mxu0 }
 0x331   :  { %v699_v56 = vadd.f32 %v698_v47, %v669_v46 }
 0x338   :  { %v726_v48 = vpop.f32.mrf.mxu0 }
 0x339   :  { %v732_v50 = vadd.f32 %v726_v48, %v696_v49 }
 0x340   :  { %v729_v55 = vpop.f32.mrf.mxu0 }
 0x341   :  { %v733_v57 = vadd.f32 %v729_v55, %v699_v56 }
 0x34e   :  { %v759_v52 = vpop.f32.mrf.mxu2 }
 0x34f   :  { %v765_v53 = vadd.f32 %v759_v52, %v732_v50 }
 0x351   :  { %v771_v54 = vadd.f32 %v906_v51, %v765_v53 }
 0x353   :  { %773 = vst.msk [vmem:[#allocation4] sm:$0xff] %vm45_vm1, %v771_v54 }
 0x356   :  { %v762_v58 = vpop.f32.mrf.mxu2 }
 0x357   :  { %v766_v59 = vadd.f32 %v762_v58, %v733_v57 }
 0x359   :  { %v772_v60 = vadd.f32 %v906_v51, %v766_v59 }
 0x35b   :  { %774 = vst.msk [vmem:[#allocation4 + $0x8] sm:$0xff] %vm45_vm1, %v772_v60 }
 0x35c   :  { %787 = dma.vmem_to_hbm [thread:$0]  %s780_s16, 256, %s782_s18, [#allocation5], %s967_s7, %s967_s7, %s968_s19  }
 0x35d   :  { %963 = dma.done.wait [#allocation5], 256  }
 0x35e   :  { %964 = vsyncadd [#allocation5], 4294967040 }
 0x35f   :  { %792 = vsyncpa [#allocation5], 1 }

</bundles_post_ra>
